<compile_context>
chip_gen: v7x
topology: tpu7x:2x2x1
jax: 0.10.0
libtpu: 0.0.40
codegen_flags: <defaults>
</compile_context>

<pallas_src>
import jax
import jax.numpy as jnp
from jax.experimental import pallas as pl
from jax.experimental.pallas import tpu as pltpu


def _passthrough_dma_kernel(img_hbm, txt_hbm, img_out, txt_out, img_sem, txt_sem):
    """Whole-array HBM->HBM DMA copies for both tensors (no VMEM staging)."""
    img_cp = pltpu.make_async_copy(img_hbm, img_out, img_sem)
    txt_cp = pltpu.make_async_copy(txt_hbm, txt_out, txt_sem)
    img_cp.start()
    txt_cp.start()
    img_cp.wait()
    txt_cp.wait()


def _pallas_passthrough(img: jax.Array, text: jax.Array):
    """Debug anchor: forward() as one fused pallas_call (HBM->HBM DMA only)."""
    bytes_moved = 2 * (img.size * img.dtype.itemsize
                       + text.size * text.dtype.itemsize)  # read + write
    return pl.pallas_call(
        _passthrough_dma_kernel,
        out_shape=(jax.ShapeDtypeStruct(img.shape, img.dtype),
                   jax.ShapeDtypeStruct(text.shape, text.dtype)),
        in_specs=[pl.BlockSpec(memory_space=pl.ANY),
                  pl.BlockSpec(memory_space=pl.ANY)],
        out_specs=(pl.BlockSpec(memory_space=pl.ANY),
                   pl.BlockSpec(memory_space=pl.ANY)),
        scratch_shapes=[pltpu.SemaphoreType.DMA,
                        pltpu.SemaphoreType.DMA],
        cost_estimate=pl.CostEstimate(flops=0, transcendentals=0,
                                      bytes_accessed=bytes_moved),
    )(img, text)


def my_clip_forward(img: jax.Array, text: jax.Array,
                    use_pallas_passthrough: bool = False):
    """Pallas equivalent of my_clip.forward(img, text) -> (img, text).

    forward() is a pure pass-through, so by default we return the inputs
    directly (no kernel, no HBM traffic).  Set use_pallas_passthrough=True to
    route through the single-DMA Pallas anchor kernel instead (debug / future
    fusion point).
    """
    if use_pallas_passthrough:
        return _pallas_passthrough(img, text)
    return img, text


# TODO(synk): encode_image / encode_text (full CLIP RN50 visual + text towers)
# are not part of forward() and are not reproduced here.


if __name__ == "__main__":
    key = jax.random.PRNGKey(0)
    k_img, k_txt = jax.random.split(key)

    # Small shapes consistent with forward()'s signature: an NCHW image batch
    # and a batch of token ids (lane-ragged on purpose -- the DMA path does not
    # care about (8, 128) layout).
    img = jax.random.normal(k_img, (2, 4, 16, 16), dtype=jnp.float32)
    text = jax.random.randint(k_txt, (2, 8), minval=0, maxval=100,
                              dtype=jnp.int32)

    # Default path: zero-cost pass-through (the recommended implementation).
    out_img, out_text = my_clip_forward(img, text)
    jax.block_until_ready((out_img, out_text))
    assert out_img.shape == img.shape and out_img.dtype == img.dtype
    assert out_text.shape == text.shape and out_text.dtype == text.dtype
    assert bool(jnp.all(out_img == img))
    assert bool(jnp.all(out_text == text))

    # Debug path: exercise the fused single-call HBM->HBM DMA Pallas kernel.
    p_img, p_text = my_clip_forward(img, text, use_pallas_passthrough=True)
    jax.block_until_ready((p_img, p_text))
    assert p_img.shape == img.shape and p_img.dtype == img.dtype
    assert p_text.shape == text.shape and p_text.dtype == text.dtype
    assert bool(jnp.all(p_img == img))
    assert bool(jnp.all(p_text == text))

    print("KERNEL_OK")
</pallas_src>

<mosaic_0001>
module attributes {stable_mosaic.version = 11 : i64} {
  func.func @_passthrough_dma_kernel(%arg0: memref<2x4x16x16xf32, #tpu.memory_space<any>>, %arg1: memref<2x8xi32, #tpu.memory_space<any>>, %arg2: memref<2x4x16x16xf32, #tpu.memory_space<any>>, %arg3: memref<2x8xi32, #tpu.memory_space<any>>, %arg4: memref<!tpu.dma_semaphore, #tpu.memory_space<semaphore_mem>>, %arg5: memref<!tpu.dma_semaphore, #tpu.memory_space<semaphore_mem>>) attributes {dimension_semantics = [], scalar_prefetch = 0 : i64, scratch_operands = 2 : i64, tpu.core_type = #tpu.core_type<tc>} {
    tpu.enqueue_dma source(%arg0 : memref<2x4x16x16xf32, #tpu.memory_space<any>>) target(%arg2 : memref<2x4x16x16xf32, #tpu.memory_space<any>>) target_semaphore(%arg4 : memref<!tpu.dma_semaphore, #tpu.memory_space<semaphore_mem>>)
    tpu.enqueue_dma source(%arg1 : memref<2x8xi32, #tpu.memory_space<any>>) target(%arg3 : memref<2x8xi32, #tpu.memory_space<any>>) target_semaphore(%arg5 : memref<!tpu.dma_semaphore, #tpu.memory_space<semaphore_mem>>)
    tpu.wait_dma2 semaphore(%arg4 : memref<!tpu.dma_semaphore, #tpu.memory_space<semaphore_mem>>) src(%arg0 : memref<2x4x16x16xf32, #tpu.memory_space<any>>) dst(%arg2 : memref<2x4x16x16xf32, #tpu.memory_space<any>>)
    tpu.wait_dma2 semaphore(%arg5 : memref<!tpu.dma_semaphore, #tpu.memory_space<semaphore_mem>>) src(%arg1 : memref<2x8xi32, #tpu.memory_space<any>>) dst(%arg3 : memref<2x8xi32, #tpu.memory_space<any>>)
    return
  }
}

</mosaic_0001>

<bundles_post_ra>
// kernel: tpu_custom_call.1
= control target key start
LH: loop header
LB: loop body
LE: loop exit
PB: predicated region body
PF: predicated region fallthrough
CT: control target
= control target key end

     0   :  { %s84_s15 = smov [#allocation2]   ;;  %s85_s16 = smov [#allocation4]   ;;  %s128_s0 = inlined_call_operand.hbm [shape: f32[2,4,16,16], index: 0, kind: input, shape index: {}]   ;;  %s129_s2 = inlined_call_operand.hbm [shape: f32[2,4,16,16], index: 2, kind: output, shape index: {0}]   ;;  %s130_s1 = inlined_call_operand.vmem [shape: s32[2,8], index: 1, kind: input, shape index: {}]   ;;  %s131_s3 = inlined_call_operand.hbm [shape: s32[2,8], index: 3, kind: output, shape index: {1}]  }
   0x1   :  { %s29_s14 = sshll.u32 %s130_s1, 4  ;;  %s86_s17 = smov 0   ;;  %s30_s14 = int_to_ptr.vmem [resolvable:$true] %s29_s14 }
   0x2   :  { %21 = dma.general %s128_s0, 2048, %s129_s2, %s84_s15, %s85_s16, [#allocation5], %s86_s17, 0  }
   0x3   :  { %s58_s22 = scalar_lea.vmem %s30_s14, 32  ;;  %p63_p1 = scmp.lt.s32.totalorder %s30_s14, %s30_s14 }
   0x4   :  { %p59_p0 = scmp.ne.s32.totalorder %s30_s14, %s58_s22  ;;  %p64_p2 = scmp.lt.s32.totalorder %s58_s22, %s58_s22 }
   0x6   :  { %p65_p3 = por %p64_p2, %p63_p1 }
   0x8   :  { %p66_p4 = pnand %p65_p3, %p59_p0 }
   0xa   :  { %69 = shalt.err (!%p66_p4)  }
   0xb   :  { %s70_s24 = scalar_lea.hbm %s131_s3, 32 }
   0xc   :  { %p71_p5 = scmp.ne.s32.totalorder %s131_s3, %s70_s24  ;;  %p74_p6 = scmp.lt.u32.totalorder %s70_s24, %s131_s3 }
   0xe   :  { %p76_p7 = pnand %p74_p6, %p71_p5 }
  0x10   :  { %79 = shalt.err (!%p76_p7)  }
  0x11   :  { %32 = dma.vmem_to_hbm [thread:$0]  %s30_s14, 32, %s131_s3, [#allocation3] }
  0x12   :  { %80 = dma.done.wait [#allocation2], 2048 }
  0x13   :  { %81 = vsyncadd [#allocation2], 4294965248 }
  0x14   :  { %82 = dma.done.wait [#allocation3], 32 }
  0x15   :  { %83 = vsyncadd [#allocation3], 4294967264 }
  0x16   :  { %41 = vsyncmov [#allocation2] }
  0x19   :  { %s42_s29 = vpop.sfrf %41 }
  0x1a   :  { %p53_p8 = scmp.ne.s32.totalorder %s42_s29, 0 }
  0x1c   :  { %46 = shalt.err (%p53_p8)  }
  0x1d   :  { %47 = vsyncmov [#allocation3] }
  0x20   :  { %s48_s30 = vpop.sfrf %47 }
  0x21   :  { %p54_p9 = scmp.ne.s32.totalorder %s48_s30, 0 }
  0x23   :  { %52 = shalt.err (%p54_p9)  }

</bundles_post_ra>
